<compile_context>
chip_gen: v6e
topology: v6e:2x2x1
jax: 0.10.0
libtpu: 0.0.40
codegen_flags: <defaults>
</compile_context>

<pallas_src>
import functools

import jax
import jax.numpy as jnp
from jax.experimental import pallas as pl
from jax.experimental.pallas import tpu as pltpu

BN_EPS = 1e-5


def _pick_c_tile(C):
    # Full C unless C is a large multiple of 128 (keeps every lane-dim block
    # either a multiple of 128 or equal to the full array dim).
    if C > 512 and C % 128 == 0:
        for t in (512, 256, 128):
            if C % t == 0:
                return t
    return C


def _pick_hw_tile(HW):
    # 512-2048 lane tiles when H*W is large; otherwise the full spatial extent
    # (allowed because it equals the array dim).
    if HW <= 1024:
        return HW
    for t in (2048, 1024, 512):
        if HW % t == 0:
            return t
    return 512  # last tile partial -> masked in the kernel


def _bnneck_kernel(x_ref, x00_ref, g_ref, b_ref, o_ref, sum_sc, sq_sc,
                   *, hw_total, hw_tile, inv_m, eps):
    # x_ref:   (C_TILE, THW)  current (n, c-tile, hw-tile) block
    # x00_ref: (N, C_TILE)    features[:, :, 0, 0], resident per C tile
    # g_ref:   (1, C_TILE)    gamma
    # b_ref:   (1, C_TILE)    beta
    # o_ref:   (N, C_TILE)    output block (written on the last reduction step)
    # sum_sc / sq_sc: (8, C_TILE) f32 accumulators (row 0 is the real sum)
    n = pl.program_id(1)
    h = pl.program_id(2)
    n_last = pl.num_programs(1) - 1
    h_last = pl.num_programs(2) - 1

    @pl.when(jnp.logical_and(n == 0, h == 0))
    def _init():
        sum_sc[...] = jnp.zeros_like(sum_sc)
        sq_sc[...] = jnp.zeros_like(sq_sc)

    xv = x_ref[...].astype(jnp.float32)                       # (C_TILE, THW)
    if hw_total % hw_tile != 0:
        # Mask padded lanes of the (only) partial H*W tile.
        lane = jax.lax.broadcasted_iota(jnp.int32, (1, hw_tile), 1)
        xv = jnp.where(lane + h * hw_tile < hw_total, xv, 0.0)

    # Reduce over the lane (H*W) axis via MXU: (8, THW) x (C_TILE, THW)^T
    # -> (8, C_TILE), so per-channel sums land lane-major (channels on lanes).
    ones_lhs = jnp.ones((8, hw_tile), jnp.float32)
    dn = (((1,), (1,)), ((), ()))
    sum_sc[...] += jax.lax.dot_general(ones_lhs, xv, dn,
                                       preferred_element_type=jnp.float32)
    sq_sc[...] += jax.lax.dot_general(ones_lhs, xv * xv, dn,
                                      preferred_element_type=jnp.float32)

    @pl.when(jnp.logical_and(n == n_last, h == h_last))
    def _finalize():
        mean = sum_sc[pl.ds(0, 1), :] * inv_m                       # (1, C_TILE)
        var = jnp.maximum(sq_sc[pl.ds(0, 1), :] * inv_m - mean * mean, 0.0)
        inv_std = jax.lax.rsqrt(var + eps)
        scale = g_ref[...] * inv_std                                # (1, C_TILE)
        shift = b_ref[...] - mean * scale
        x00 = x00_ref[...].astype(jnp.float32)                      # (N, C_TILE)
        o_ref[...] = (x00 * scale + shift).astype(o_ref.dtype)


def bnneck_head(x, gamma, beta, *, eps=BN_EPS):
    """x: (N, C, H, W); gamma, beta: (C,).  Returns (N, C)."""
    N, C, H, W = x.shape
    HW = H * W

    x3 = x.reshape(N, C, HW)          # free view of the native NCHW layout
    x00 = x[:, :, 0, 0]               # (N, C) tiny side input (32B at test size)
    g = gamma.reshape(1, C).astype(jnp.float32)
    b = beta.reshape(1, C).astype(jnp.float32)

    c_tile = _pick_c_tile(C)
    thw = _pick_hw_tile(HW)
    grid = (C // c_tile, N, pl.cdiv(HW, thw))

    kernel = functools.partial(
        _bnneck_kernel, hw_total=HW, hw_tile=thw,
        inv_m=1.0 / float(N * HW), eps=float(eps))

    # Explicit scoped-VMEM budget: double-buffered data block + headroom.
    x_block_bytes = c_tile * thw * x.dtype.itemsize
    vmem_limit = int(min(48 * 1024 * 1024,
                         max(16 * 1024 * 1024, 4 * x_block_bytes + (2 << 20))))

    return pl.pallas_call(
        kernel,
        out_shape=jax.ShapeDtypeStruct((N, C), x.dtype),
        grid=grid,
        in_specs=[
            pl.BlockSpec((None, c_tile, thw), lambda c, n, h: (n, c, h)),
            pl.BlockSpec((N, c_tile), lambda c, n, h: (0, c)),
            pl.BlockSpec((1, c_tile), lambda c, n, h: (0, c)),
            pl.BlockSpec((1, c_tile), lambda c, n, h: (0, c)),
        ],
        out_specs=pl.BlockSpec((N, c_tile), lambda c, n, h: (0, c)),
        scratch_shapes=[pltpu.VMEM((8, c_tile), jnp.float32),
                        pltpu.VMEM((8, c_tile), jnp.float32)],
        compiler_params=pltpu.CompilerParams(
            dimension_semantics=("parallel", "arbitrary", "arbitrary"),
            vmem_limit_bytes=vmem_limit),
    )(x3, x00, g, b)


def bnneck_head_ref(x, gamma, beta):
    """Pure-JAX reference of PyTorch BatchNorm2d (train mode) + [..., 0, 0]."""
    mean = jnp.mean(x, axis=(0, 2, 3), keepdims=True)
    var = jnp.mean((x - mean) ** 2, axis=(0, 2, 3), keepdims=True)  # biased
    y = (x - mean) / jnp.sqrt(var + BN_EPS)
    y = y * gamma.reshape(1, -1, 1, 1) + beta.reshape(1, -1, 1, 1)
    return y[..., 0, 0]


if __name__ == "__main__":
    # Small shapes: batch=2, channels=4 (in_feat), spatial=16x16.
    N, C, H, W = 2, 4, 16, 16

    key = jax.random.PRNGKey(0)
    x = jax.random.normal(key, (N, C, H, W), dtype=jnp.float32)

    # weights_init_kaiming on BatchNorm2d: weight <- 1.0, bias <- 0.0
    # (bias.requires_grad_(False) has no effect on the forward pass).
    gamma = jnp.ones((C,), dtype=jnp.float32)
    beta = jnp.zeros((C,), dtype=jnp.float32)

    out = bnneck_head(x, gamma, beta)
    out = jax.block_until_ready(out)

    ref = bnneck_head_ref(x, gamma, beta)
    assert out.shape == (N, C)
    assert jnp.allclose(out, ref, atol=1e-3, rtol=1e-3), (out, ref)

    print("KERNEL_OK")
</pallas_src>

<mosaic_0001>
module attributes {stable_mosaic.version = 11 : i64} {
  func.func @_bnneck_kernel(%arg0: i32, %arg1: i32, %arg2: i32, %arg3: memref<1x4x256xf32, #tpu.memory_space<vmem>>, %arg4: memref<2x4xf32, #tpu.memory_space<vmem>>, %arg5: memref<1x4xf32, #tpu.memory_space<vmem>>, %arg6: memref<1x4xf32, #tpu.memory_space<vmem>>, %arg7: memref<2x4xf32, #tpu.memory_space<vmem>>, %arg8: memref<8x4xf32, #tpu.memory_space<vmem>>, %arg9: memref<8x4xf32, #tpu.memory_space<vmem>>) attributes {dimension_semantics = [#tpu.dimension_semantics<parallel>, #tpu.dimension_semantics<arbitrary>, #tpu.dimension_semantics<arbitrary>], iteration_bounds = array<i64: 1, 2, 1>, scalar_prefetch = 0 : i64, scratch_operands = 2 : i64, tpu.core_type = #tpu.core_type<tc>, window_params = [{transform_indices = @transform_0, window_bounds = array<i64: 1, 4, 256>}, {transform_indices = @transform_1, window_bounds = array<i64: 2, 4>}, {transform_indices = @transform_2, window_bounds = array<i64: 1, 4>}, {transform_indices = @transform_3, window_bounds = array<i64: 1, 4>}, {transform_indices = @transform_4, window_bounds = array<i64: 2, 4>}]} {
    %c0_i32 = arith.constant 0 : i32
    %0 = arith.cmpi eq, %arg1, %c0_i32 : i32
    %c0_i32_0 = arith.constant 0 : i32
    %1 = arith.cmpi eq, %arg2, %c0_i32_0 : i32
    %2 = arith.andi %0, %1 : i1
    %3 = arith.extui %2 : i1 to i32
    %c0_i32_1 = arith.constant 0 : i32
    %4 = arith.cmpi ne, %3, %c0_i32_1 : i32
    scf.if %4 {
      %cst_16 = arith.constant 0.000000e+00 : f32
      %22 = vector.broadcast %cst_16 : f32 to vector<8x4xf32>
      %c0_17 = arith.constant 0 : index
      %c0_18 = arith.constant 0 : index
      %23 = vector.load %arg8[%c0_17, %c0_18] : memref<8x4xf32, #tpu.memory_space<vmem>>, vector<8x4xf32>
      tpu.vector_store %arg8[%c0_17, %c0_18], %22 {strides = array<i32>} : memref<8x4xf32, #tpu.memory_space<vmem>>, vector<8x4xf32>,
      %cst_19 = arith.constant 0.000000e+00 : f32
      %24 = vector.broadcast %cst_19 : f32 to vector<8x4xf32>
      %c0_20 = arith.constant 0 : index
      %c0_21 = arith.constant 0 : index
      %25 = vector.load %arg9[%c0_20, %c0_21] : memref<8x4xf32, #tpu.memory_space<vmem>>, vector<8x4xf32>
      tpu.vector_store %arg9[%c0_20, %c0_21], %24 {strides = array<i32>} : memref<8x4xf32, #tpu.memory_space<vmem>>, vector<8x4xf32>,
    } else {
    }
    %c0 = arith.constant 0 : index
    %c0_2 = arith.constant 0 : index
    %c0_3 = arith.constant 0 : index
    %5 = vector.load %arg3[%c0, %c0_2, %c0_3] : memref<1x4x256xf32, #tpu.memory_space<vmem>>, vector<1x4x256xf32>
    %6 = vector.shape_cast %5 : vector<1x4x256xf32> to vector<4x256xf32>
    %cst = arith.constant 1.000000e+00 : f32
    %7 = vector.broadcast %cst : f32 to vector<8x256xf32>
    %c0_4 = arith.constant 0 : index
    %c0_5 = arith.constant 0 : index
    %8 = vector.load %arg8[%c0_4, %c0_5] : memref<8x4xf32, #tpu.memory_space<vmem>>, vector<8x4xf32>
    %cst_6 = arith.constant dense<0.000000e+00> : vector<8x4xf32>
    %9 = tpu.matmul %7, %6, %cst_6 {dimension_numbers = #tpu.dot_dimension_numbers<[1], [1], [0], [0], [0, 0, 1, 0], [], []>} : vector<8x256xf32>, vector<4x256xf32>, vector<8x4xf32> -> vector<8x4xf32>
    %10 = arith.addf %8, %9 : vector<8x4xf32>
    %c0_7 = arith.constant 0 : index
    %c0_8 = arith.constant 0 : index
    %11 = vector.load %arg8[%c0_7, %c0_8] : memref<8x4xf32, #tpu.memory_space<vmem>>, vector<8x4xf32>
    tpu.vector_store %arg8[%c0_7, %c0_8], %10 {strides = array<i32>} : memref<8x4xf32, #tpu.memory_space<vmem>>, vector<8x4xf32>,
    %c0_9 = arith.constant 0 : index
    %c0_10 = arith.constant 0 : index
    %12 = vector.load %arg9[%c0_9, %c0_10] : memref<8x4xf32, #tpu.memory_space<vmem>>, vector<8x4xf32>
    %13 = arith.mulf %6, %6 : vector<4x256xf32>
    %cst_11 = arith.constant dense<0.000000e+00> : vector<8x4xf32>
    %14 = tpu.matmul %7, %13, %cst_11 {dimension_numbers = #tpu.dot_dimension_numbers<[1], [1], [0], [0], [0, 0, 1, 0], [], []>} : vector<8x256xf32>, vector<4x256xf32>, vector<8x4xf32> -> vector<8x4xf32>
    %15 = arith.addf %12, %14 : vector<8x4xf32>
    %c0_12 = arith.constant 0 : index
    %c0_13 = arith.constant 0 : index
    %16 = vector.load %arg9[%c0_12, %c0_13] : memref<8x4xf32, #tpu.memory_space<vmem>>, vector<8x4xf32>
    tpu.vector_store %arg9[%c0_12, %c0_13], %15 {strides = array<i32>} : memref<8x4xf32, #tpu.memory_space<vmem>>, vector<8x4xf32>,
    %c1_i32 = arith.constant 1 : i32
    %17 = arith.cmpi eq, %arg1, %c1_i32 : i32
    %c0_i32_14 = arith.constant 0 : i32
    %18 = arith.cmpi eq, %arg2, %c0_i32_14 : i32
    %19 = arith.andi %17, %18 : i1
    %20 = arith.extui %19 : i1 to i32
    %c0_i32_15 = arith.constant 0 : i32
    %21 = arith.cmpi ne, %20, %c0_i32_15 : i32
    scf.if %21 {
      %c0_16 = arith.constant 0 : index
      %c0_17 = arith.constant 0 : index
      %22 = vector.load %arg8[%c0_16, %c0_17] : memref<8x4xf32, #tpu.memory_space<vmem>>, vector<1x4xf32>
      %cst_18 = arith.constant 0.001953125 : f32
      %23 = vector.broadcast %cst_18 : f32 to vector<1x4xf32>
      %24 = arith.mulf %22, %23 : vector<1x4xf32>
      %c0_19 = arith.constant 0 : index
      %c0_20 = arith.constant 0 : index
      %25 = vector.load %arg9[%c0_19, %c0_20] : memref<8x4xf32, #tpu.memory_space<vmem>>, vector<1x4xf32>
      %cst_21 = arith.constant 0.001953125 : f32
      %26 = vector.broadcast %cst_21 : f32 to vector<1x4xf32>
      %27 = arith.mulf %25, %26 : vector<1x4xf32>
      %28 = arith.mulf %24, %24 : vector<1x4xf32>
      %29 = arith.subf %27, %28 : vector<1x4xf32>
      %cst_22 = arith.constant 0.000000e+00 : f32
      %30 = vector.broadcast %cst_22 : f32 to vector<1x4xf32>
      %31 = arith.maximumf %29, %30 : vector<1x4xf32>
      %cst_23 = arith.constant 9.99999974E-6 : f32
      %32 = vector.broadcast %cst_23 : f32 to vector<1x4xf32>
      %33 = arith.addf %31, %32 : vector<1x4xf32>
      %34 = math.rsqrt %33 : vector<1x4xf32>
      %c0_24 = arith.constant 0 : index
      %c0_25 = arith.constant 0 : index
      %35 = vector.load %arg5[%c0_24, %c0_25] : memref<1x4xf32, #tpu.memory_space<vmem>>, vector<1x4xf32>
      %36 = arith.mulf %35, %34 : vector<1x4xf32>
      %c0_26 = arith.constant 0 : index
      %c0_27 = arith.constant 0 : index
      %37 = vector.load %arg6[%c0_26, %c0_27] : memref<1x4xf32, #tpu.memory_space<vmem>>, vector<1x4xf32>
      %38 = arith.mulf %24, %36 : vector<1x4xf32>
      %39 = arith.subf %37, %38 : vector<1x4xf32>
      %c0_28 = arith.constant 0 : index
      %c0_29 = arith.constant 0 : index
      %40 = vector.load %arg4[%c0_28, %c0_29] : memref<2x4xf32, #tpu.memory_space<vmem>>, vector<2x4xf32>
      %41 = vector.broadcast %36 : vector<1x4xf32> to vector<2x4xf32>
      %42 = arith.mulf %40, %41 : vector<2x4xf32>
      %43 = vector.broadcast %39 : vector<1x4xf32> to vector<2x4xf32>
      %44 = arith.addf %42, %43 : vector<2x4xf32>
      %c0_30 = arith.constant 0 : index
      %c0_31 = arith.constant 0 : index
      %45 = vector.load %arg7[%c0_30, %c0_31] : memref<2x4xf32, #tpu.memory_space<vmem>>, vector<2x4xf32>
      tpu.vector_store %arg7[%c0_30, %c0_31], %44 {strides = array<i32>} : memref<2x4xf32, #tpu.memory_space<vmem>>, vector<2x4xf32>,
    } else {
    }
    return
  }
  func.func @transform_0(%arg0: i32, %arg1: i32, %arg2: i32) -> (i32, i32, i32) {
    %c0_i32 = arith.constant 0 : i32
    return %arg1, %arg0, %arg2 : i32, i32, i32
  }
  func.func @transform_1(%arg0: i32, %arg1: i32, %arg2: i32) -> (i32, i32) {
    %c0_i32 = arith.constant 0 : i32
    %c0_i32_0 = arith.constant 0 : i32
    return %c0_i32, %arg0 : i32, i32
  }
  func.func @transform_2(%arg0: i32, %arg1: i32, %arg2: i32) -> (i32, i32) {
    %c0_i32 = arith.constant 0 : i32
    %c0_i32_0 = arith.constant 0 : i32
    return %c0_i32, %arg0 : i32, i32
  }
  func.func @transform_3(%arg0: i32, %arg1: i32, %arg2: i32) -> (i32, i32) {
    %c0_i32 = arith.constant 0 : i32
    %c0_i32_0 = arith.constant 0 : i32
    return %c0_i32, %arg0 : i32, i32
  }
  func.func @transform_4(%arg0: i32, %arg1: i32, %arg2: i32) -> (i32, i32) {
    %c0_i32 = arith.constant 0 : i32
    %c0_i32_0 = arith.constant 0 : i32
    return %c0_i32, %arg0 : i32, i32
  }
}

</mosaic_0001>

<bundles_post_ra>
// kernel: tpu_custom_call.1
= control target key start
LH: loop header
LB: loop body
LE: loop exit
PB: predicated region body
PF: predicated region fallthrough
CT: control target
= control target key end

     0   :  { %9 = vsyncpa [#allocation5], 0  ;;  %s1007_s0 = inlined_call_operand.hbm [shape: f32[2,4,256], index: 0, kind: input, shape index: {}]   ;;  %s1008_s1 = inlined_call_operand.hbm [shape: f32[2,4], index: 1, kind: input, shape index: {}]   ;;  %s1009_s2 = inlined_call_operand.vmem [shape: f32[1,4], index: 2, kind: input, shape index: {}]   ;;  %s1010_s3 = inlined_call_operand.vmem [shape: f32[1,4], index: 3, kind: input, shape index: {}]   ;;  %s1011_s4 = inlined_call_operand.hbm [shape: f32[2,4], index: 4, kind: output, shape index: {}]  }
   0x1   :  { %11 = vsyncpa [#allocation5 + $0x1], 0 }
   0x2   :  { %12 = vsyncpa [#allocation8], 0 }
   0x3   :  { %13 = vsyncpa [#allocation6], 0  ;;  %s864_s15 = smov 0   ;;  %s866_s16 = smov 0  }
   0x4   :  { %s868_s17 = smov 0   ;;  %s870_s18 = smov 0  }
   0x5   :  { %s872_s19 = smov 0   ;;  %s874_s20 = smov 0  }
   0x6 LB: > { %s597_s21 = sadd.s32 4294967295, %s832_s20   ;;  %p62_p0 = scmp.ne.s32.totalorder %s816_s16, %s812_s15  ;;  %s832_s20 = sphi %s874_s20, %s19_s20   ;;  %s828_s19 = sphi %s872_s19, %s1022_s19   ;;  %s824_s18 = sphi %s870_s18, %s1021_s18   ;;  %s820_s17 = sphi %s868_s17, %s1020_s17   ;;  %s816_s16 = sphi %s866_s16, %s1019_s16   ;;  %s812_s15 = sphi %s864_s15, %s1018_s15  }
   0x7   : > { %p896_p1 = scmp.eq.s32.totalorder %s597_s21, 0  ;;  %p598_p2 = scmp.ge.s32.totalorder %s832_s20, 1 }
   0x8   : > { %p177_p3 = scmp.lt.s32.totalorder %s832_s20, 3  ;;  %s834_s25 = smov [#allocation7]  }
   0x9   : > { %p904_p4 = por %p896_p1, %p62_p0  ;;  %s192_s26 = sshll.u32 %s834_s25, 4  ;;  %s193_s26 = int_to_ptr.vmem [resolvable:$true] %s192_s26 }
   0xa   : > { %p908_p5 = pnand %p598_p2, %p177_p3  ;;  %s34_s28 = sadd.s32 1, %s828_s19 }
   0xb   : > { %s49_s29 = sadd.s32 1, %s820_s17  ;;  %p36_p8 = scmp.ge.s32.totalorder %s34_s28, 2 }
   0xc   : > { %p628_p6 = pneg %p908_p5  ;;  %s707_s30 = scalar_lea.vmem %s193_s26, 32 }
   0xd   : > { %p708_p10 = scmp.ne.s32.totalorder %s193_s26, %s707_s30  ;;  %p715_p13 = scmp.lt.s32.totalorder %s193_s26, %s193_s26 }
   0xe   : > { %p916_p7 = pnand %p628_p6, %p896_p1  ;;  %p716_p0 = scmp.lt.s32.totalorder %s707_s30, %s707_s30 }
  0x10   : > { %p698_p9 = pneg %p916_p7  ;;  %p717_p2 = por %p716_p0, %p715_p13 }
  0x12   : > { %p710_p11 = pnand %p708_p10, %p698_p9 }
  0x14   : > { %p711_p12 = pneg %p710_p11 }
  0x16   : > { %p718_p3 = pnand %p717_p2, %p711_p12 }
  0x18   : > { %721 = shalt.err (!%p718_p3)
}
  0x19   : > { %631 = dma.hbm_to_vmem [thread:$0]  (!%p916_p7), %s1008_s1, 32, %s193_s26, [#allocation8]  }
  0x1a   : > { %s1024_s28 = smov (%p36_p8, %s34_s28), 0  ;;  %p56_p6 = scmp.ne.s32.totalorder %s820_s17, %s816_s16 }
  0x1b   : > { %p57_p9 = scmp.eq.s32.totalorder %s832_s20, 0  ;;  %s42_s7 = ssub.s32 %s828_s19, %s1024_s28 }
  0x1c   : > { %p637_p10 = scmp.lt.s32.totalorder %s832_s20, 2  ;;  %p47_p11 = scmp.eq.s32.totalorder %s42_s7, 0 }
  0x1d   : > { %p58_p12 = por %p57_p9, %p56_p6  ;;  %s215_s8 = sand.u32 1, %s820_s17  }
  0x1e   : > { %s615_s9 = sshll.u32 %s828_s19, 7  ;;  %s603_s11 = sshll.u32 %s215_s8, 3 }
  0x1f   : > { %s940_s10 = scalar_select %p47_p11, %s820_s17, %s49_s29  }
  0x20   : > { %s229_s14 = scalar_lea.hbm %s1007_s0, %s615_s9  ;;  %s219_s15 = scalar_lea.vmem [#allocation4], %s603_s11 }
  0x21   : > { %s231_s25 = sshll.u32 %s219_s15, 4  ;;  %p945_p7 = pnand %p637_p10, %p58_p12  ;;  %s232_s25 = int_to_ptr.vmem [resolvable:$true] %s231_s25 }
  0x22   : > { %s216_s27 = scalar_lea.sflag [#allocation5], %s215_s8  ;;  %s735_s30 = scalar_lea.vmem %s232_s25, 128 }
  0x23   : > { %p724_p8 = pneg %p945_p7  ;;  %p736_p13 = scmp.ne.s32.totalorder %s232_s25, %s735_s30 }
  0x24   : > { %s835_s29 = smov [#allocation4]  }
  0x25   : > { %p738_p0 = pnand %p736_p13, %p724_p8  ;;  %s740_s5 = sshll.u32 %s835_s29, 4  ;;  %s741_s5 = int_to_ptr.vmem [resolvable:$false] %s740_s5 }
  0x26   : > { %s742_s6 = scalar_lea.vmem %s741_s5, 256  ;;  %p743_p3 = scmp.lt.s32.totalorder %s232_s25, %s741_s5 }
  0x27   : > { %p739_p2 = pneg %p738_p0  ;;  %p744_p6 = scmp.lt.s32.totalorder %s742_s6, %s735_s30 }
  0x29   : > { %p745_p9 = por %p744_p6, %p743_p3 }
  0x2b   : > { %p746_p10 = pnand %p745_p9, %p739_p2 }
  0x2d   : > { %749 = shalt.err (!%p746_p10)
}
  0x2e   : > { %635 = dma.hbm_to_vmem [thread:$0]  (!%p945_p7), %s229_s14, 128, %s232_s25, %s216_s27  }
  0x2f   : > { %240 = sbr.rel (%p908_p5) target bundleno = 322 (0x142), region = 36  ;;  %s242_s7 = sand.u32 (!%p908_p5), 1, %s816_s16  }
  0x30   : > { %s607_s8 = sshll.u32 (!%p908_p5), %s242_s7, 3  ;;  %s243_s9 = scalar_lea.sflag (!%p908_p5), [#allocation5], %s242_s7 }
  0x31   : > { %s246_s11 = scalar_lea.vmem (!%p908_p5), [#allocation4], %s607_s8 }
  0x34   : > { %799 = dma.done.wait (%p904_p4), %s243_s9, 128  }
  0x35   : > { %801 = vsyncadd (%p904_p4), %s243_s9, 4294967168 }
  0x36   : > { %803 = dma.done.wait (%p896_p1), [#allocation8], 32  }
  0x37   : > { %805 = vsyncadd (%p896_p1), [#allocation8], 4294967264  ;;  %p283_p11 = scmp.eq.s32.totalorder %s824_s18, 0 }
  0x38   : > { %vm289_vm0 = vcmask (%p283_p11), 31744   ;;  %v836_v0 = vmov (%p283_p11), 0.0  }
  0x39   : > { %288 = sbr.rel (!%p283_p11) target bundleno = 62 (0x3e), region = 48  ;;  %290 = vst.msk [vmem:[#allocation2] sm:$0xff] (%p283_p11), %vm289_vm0, %v836_v0  ;;  %291 = vst.msk [vmem:[#allocation3] sm:$0xff] (%p283_p11), %vm289_vm0, %v836_v0 }
  0x3e PF: > { %v292_v1 = vld [vmem:[%s246_s11] sm:$0xff]  ;;  %v837_v4 = vmov 1.0   ;;  %p447_p1 = scmp.eq.s32.totalorder %s824_s18, 1  ;;  %vm368_vm1 = vcmask 31744  }
  0x3f   : > { %v295_v2 = vcombine.high %v292_v1, %v292_v1  ;;  %v371_v3 = vmul.f32 %v292_v1, %v292_v1  ;;  %361 = vmatprep.mubr.f32.mxu0 %v837_v4  ;;  %439 = vmatprep.mubr.f32.mxu1 %v837_v4  ;;  %v468_v22 = vlaneseq (%p447_p1)  ;;  %v461_v24 = vld [vmem:[%s1009_s2] sm:$0x1] (%p447_p1)  ;;  %vm481_vm2 = vcmask (%p447_p1), 25600  }
  0x40   : > { %v293_v6 = vld [vmem:[#allocation2] sm:$0xff]  ;;  %v370_v8 = vld [vmem:[#allocation3] sm:$0xff] }
  0x41   : > { %327 = vmatprep.subr.mxu0 %v295_v2  ;;  %v373_v5 = vcombine.high %v371_v3, %v371_v3  ;;  %v469_v23 = vshrl.u32 (%p447_p1), %v468_v22, 7  ;;  %v463_v28 = vld [vmem:[%s1010_s3] sm:$0x1] (%p447_p1) }
  0x42   : > { %328 = vmatpush1.xpose.msra.mxu0 %v292_v1  ;;  %v466_v29 = vld [vmem:[#allocation7] sm:$0x3] (%p447_p1) }
  0x43   : > { %405 = vmatprep.subr.mxu1 %v373_v5  ;;  %v470_v25 = vsub.s32 (%p447_p1), 0, %v469_v23 }
  0x44   : > { %406 = vmatpush1.xpose.msra.mxu1 %v371_v3 }
  0x45   : > { %362 = vmatmul.mubr.f32.vlgmr.msra.gmra.mxu0 %v837_v4 }
  0x47   : > { %440 = vmatmul.mubr.f32.vlgmr.msra.gmra.mxu1 %v837_v4 }
 0x105   : > { %v363_v7 = vpop.f32.mrf.mxu0 }
 0x106   : > { %v367_v9 = vadd.f32 %v363_v7, %v293_v6  ;;  %451 = sbr.rel (!%p447_p1) target bundleno = 307 (0x133), region = 52 }
 0x107   : > { %v365_v10 = vpop.f32.mrf.mxu0  ;;  %v441_v11 = vpop.f32.mrf.mxu1 }
 0x108   : > { %369 = vst.msk [vmem:[#allocation2] sm:$0xff] %vm368_vm1, %v367_v9  ;;  %v445_v12 = vadd.f32 %v441_v11, %v370_v8 }
 0x109   : > { %v443_v13 = vpop.f32.mrf.mxu1 }
 0x10a   : > { %446 = vst.msk [vmem:[#allocation3] sm:$0xff] %vm368_vm1, %v445_v12 }
 0x10f   : > { %v452_v14 = vld [vmem:[#allocation2] sm:$0x1] }
 0x110   : > { %v453_v16 = vmul.f32 0.001953125, %v452_v14 }
 0x111   : > { %v454_v15 = vld [vmem:[#allocation3] sm:$0x1] }
 0x112   : > { %v455_v17 = vmul.f32 0.001953125, %v454_v15  ;;  %v456_v18 = vmul.f32 %v453_v16, %v453_v16 }
 0x114   : > { %v457_v19 = vsub.f32 %v455_v17, %v456_v18 }
 0x116   : > { %v458_v20 = vmax.f32 %v457_v19, 0.0 }
 0x118   : > { %v459_v21 = vadd.f32 1e-05, %v458_v20 }
 0x11a   : > { %694 = vrsqrt.f32 %v459_v21 }
 0x127   : > { %v695_v26 = vpop.eup %694 }
 0x128   : > { %v462_v27 = vmul.f32 %v695_v26, %v461_v24 }
 0x12a   : > { %v464_v30 = vmul.f32 %v462_v27, %v453_v16  ;;  %v471_v31 = vrot.slane %v462_v27, %v470_v25 }
 0x12c   : > { %v465_v32 = vsub.f32 %v463_v28, %v464_v30  ;;  %v473_v33 = vmul.f32 %v471_v31, %v466_v29 }
 0x12e   : > { %v478_v34 = vrot.slane %v465_v32, %v470_v25 }
 0x130   : > { %v480_v35 = vadd.f32 %v478_v34, %v473_v33 }
 0x132   : > { %482 = vst.msk [vmem:[#allocation9] sm:$0x3] %vm481_vm2, %v480_v35 }
 0x133 PF: > { %p974_p4 = scmp.eq.s32.totalorder %s597_s21, 1  ;;  %s838_s13 = smov [#allocation9]  }
 0x134   : > { %s492_s14 = sshll.u32 %s838_s13, 4  ;;  %s493_s14 = int_to_ptr.vmem [resolvable:$true] %s492_s14 }
 0x135   : > { %s750_s15 = scalar_lea.vmem %s493_s14, 32  ;;  %p757_p8 = scmp.lt.s32.totalorder %s493_s14, %s493_s14 }
 0x136   : > { %p751_p5 = scmp.ne.s32.totalorder %s493_s14, %s750_s15  ;;  %p758_p13 = scmp.lt.s32.totalorder %s750_s15, %s750_s15 }
 0x138   : > { %p752_p12 = pnand %p751_p5, %p974_p4  ;;  %p759_p0 = por %p758_p13, %p757_p8 }
 0x13a   : > { %p753_p7 = pneg %p752_p12 }
 0x13c   : > { %p760_p2 = pnand %p759_p0, %p753_p7 }
 0x13e   : > { %763 = shalt.err (!%p760_p2)
}
 0x13f   : > { %625 = dma.vmem_to_hbm [thread:$0]  (%p974_p4), %s493_s14, 32, %s1011_s4, [#allocation6]  }
 0x140   : > { %807 = dma.done.wait (%p974_p4), [#allocation6], 32  }
 0x141   : > { %809 = vsyncadd (%p974_p4), [#allocation6], 4294967264 }
 0x142 PF: > { %s19_s20 = sadd.s32 1, %s832_s20   ;;  %s1018_s15 = smov %s816_s16 }
 0x143   : > { %p16_p3 = scmp.ge.s32.totalorder %s19_s20, 4   ;;  %s1019_s16 = smov %s820_s17 }
 0x144   : > { %s1020_s17 = smov %s940_s10  ;;  %s1021_s18 = smov %s828_s19 }
 0x145   : > { %s1022_s19 = smov %s1024_s28  ;;  %18 = sbr.rel (!%p16_p3) target bundleno = 6 (0x6), region = 93 }
 0x14a   :  { %505 = vsyncpa [#allocation5], 1 }
 0x14b   :  { %507 = vsyncpa [#allocation5 + $0x1], 1 }
 0x14c   :  { %508 = vsyncpa [#allocation8], 1 }
 0x14d   :  { %509 = vsyncpa [#allocation6], 1 }
 0x14e   :  { %511 = vsyncpa [#allocation6 + $0x1], 1 }

</bundles_post_ra>
